<compile_context>
chip_gen: v5e
topology: v5e:2x2
jax: 0.10.0
libtpu: 0.0.40
codegen_flags: <defaults>
</compile_context>

<pallas_src>
import functools

import jax
import jax.numpy as jnp
from jax.experimental import pallas as pl
from jax.experimental.pallas import tpu as pltpu


def _multilabel_loss_kernel(out_ref, tgt_ref, loss_ref, acc_ref, *, batch_size):
    i = pl.program_id(0)

    @pl.when(i == 0)
    def _init():
        acc_ref[...] = jnp.zeros_like(acc_ref)

    x = out_ref[...].astype(jnp.float32)
    t = tgt_ref[...].astype(jnp.float32)

    # Mask rows beyond the real batch (last tile when B % TB != 0): zero both
    # logits and targets so padded garbage cannot produce NaN/Inf in the sum.
    tb = x.shape[0]
    row_ids = i * tb + jax.lax.broadcasted_iota(jnp.int32, (tb, 1), 0)
    valid = row_ids < batch_size
    x = jnp.where(valid, x, 0.0)
    t = jnp.where(valid, t, 0.0)

    # Numerically-stable log-softmax pieces along the class (lane) axis.
    m = jnp.max(x, axis=-1, keepdims=True)
    shifted = x - m
    lse = jnp.log(jnp.sum(jnp.exp(shifted), axis=-1, keepdims=True))

    # sum((shifted - lse) * t) without materializing log_probs:
    row_t = jnp.sum(t, axis=-1, keepdims=True)
    partial = jnp.sum(shifted * t) - jnp.sum(lse * row_t)

    acc_ref[...] += partial

    @pl.when(i == pl.num_programs(0) - 1)
    def _finalize():
        loss_ref[...] = -acc_ref[...] / jnp.float32(batch_size)


def multilabel_loss(outputs: jax.Array, targets: jax.Array, *,
                    max_rows: int = 512,
                    vmem_budget_bytes: int = 12 * 1024 * 1024) -> jax.Array:
    """Pallas TPU implementation of Multilabel.forward (2-D logits/targets)."""
    assert outputs.shape == targets.shape and outputs.ndim == 2
    b, c = outputs.shape
    itemsize = max(jnp.dtype(outputs.dtype).itemsize,
                   jnp.dtype(targets.dtype).itemsize)

    # 2 inputs x 2 pipeline buffers of (tb, c) must fit a conservative scoped
    # VMEM budget (safe on v5e 16 MiB / v7x 32 MiB defaults).
    rows_fit = max(1, vmem_budget_bytes // (4 * c * itemsize))
    tb = min(max_rows, rows_fit)
    tb = max(8, (tb // 8) * 8)          # multiple of 8 -> clean sublane mapping
    if tb >= b:
        tb = b                          # single block; full-extent is always legal
    num_tiles = pl.cdiv(b, tb)

    kernel = functools.partial(_multilabel_loss_kernel, batch_size=b)

    loss = pl.pallas_call(
        kernel,
        out_shape=jax.ShapeDtypeStruct((1, 1), jnp.float32),
        grid_spec=pltpu.PrefetchScalarGridSpec(
            num_scalar_prefetch=0,
            grid=(num_tiles,),
            in_specs=[
                pl.BlockSpec((tb, c), lambda i: (i, 0)),
                pl.BlockSpec((tb, c), lambda i: (i, 0)),
            ],
            out_specs=pl.BlockSpec((1, 1), lambda i: (0, 0)),
            scratch_shapes=[pltpu.VMEM((1, 1), jnp.float32)],
        ),
        compiler_params=pltpu.CompilerParams(
            dimension_semantics=("arbitrary",)),  # accumulator axis is serial
    )(outputs, targets)
    return loss[0, 0]


def _reference(outputs, targets):
    return -jnp.sum(jax.nn.log_softmax(outputs.astype(jnp.float32), axis=1)
                    * targets.astype(jnp.float32)) / outputs.shape[0]


if __name__ == "__main__":
    key = jax.random.PRNGKey(0)
    k1, k2 = jax.random.split(key)

    # Small shapes; batch deliberately NOT a multiple of the tile so the
    # grid + row-masking path is exercised (20 rows, TB forced to 8 -> 3 tiles).
    batch, num_classes = 20, 128
    outputs = jax.random.normal(k1, (batch, num_classes), dtype=jnp.float32)
    targets = (jax.random.uniform(k2, (batch, num_classes)) > 0.8).astype(jnp.float32)

    # Tiled path (grid of 3, masked last tile).
    loss_tiled = multilabel_loss(outputs, targets, max_rows=8)
    jax.block_until_ready(loss_tiled)

    # Default path (single full block since batch is small).
    loss_default = multilabel_loss(outputs, targets)
    jax.block_until_ready(loss_default)

    ref = _reference(outputs, targets)
    assert jnp.allclose(loss_tiled, ref, rtol=1e-5, atol=1e-5), (loss_tiled, ref)
    assert jnp.allclose(loss_default, ref, rtol=1e-5, atol=1e-5), (loss_default, ref)

    print("KERNEL_OK")
</pallas_src>

<mosaic_0001>
module attributes {stable_mosaic.version = 11 : i64} {
  func.func @_multilabel_loss_kernel(%arg0: i32, %arg1: memref<8x128xf32, #tpu.memory_space<vmem>>, %arg2: memref<8x128xf32, #tpu.memory_space<vmem>>, %arg3: memref<1x1xf32, #tpu.memory_space<vmem>>, %arg4: memref<1x1xf32, #tpu.memory_space<vmem>>) attributes {dimension_semantics = [#tpu.dimension_semantics<arbitrary>], iteration_bounds = array<i64: 3>, scalar_prefetch = 0 : i64, scratch_operands = 1 : i64, tpu.core_type = #tpu.core_type<tc>, window_params = [{transform_indices = @transform_0, window_bounds = array<i64: 8, 128>}, {transform_indices = @transform_1, window_bounds = array<i64: 8, 128>}, {pipeline_mode = #tpu.pipeline_mode<synchronous>, transform_indices = @transform_2, window_bounds = array<i64: 1, 1>}]} {
    %c0_i32 = arith.constant 0 : i32
    %0 = arith.cmpi eq, %arg0, %c0_i32 : i32
    %1 = arith.extui %0 : i1 to i32
    %c0_i32_0 = arith.constant 0 : i32
    %2 = arith.cmpi ne, %1, %c0_i32_0 : i32
    scf.if %2 {
      %cst_15 = arith.constant 0.000000e+00 : f32
      %47 = vector.broadcast %cst_15 : f32 to vector<1x1xf32>
      %c0_16 = arith.constant 0 : index
      %c0_17 = arith.constant 0 : index
      %48 = vector.load %arg4[%c0_16, %c0_17] : memref<1x1xf32, #tpu.memory_space<vmem>>, vector<1x1xf32>
      tpu.vector_store %arg4[%c0_16, %c0_17], %47 {strides = array<i32>} : memref<1x1xf32, #tpu.memory_space<vmem>>, vector<1x1xf32>,
    } else {
    }
    %c0 = arith.constant 0 : index
    %c0_1 = arith.constant 0 : index
    %3 = vector.load %arg1[%c0, %c0_1] : memref<8x128xf32, #tpu.memory_space<vmem>>, vector<8x128xf32>
    %c0_2 = arith.constant 0 : index
    %c0_3 = arith.constant 0 : index
    %4 = vector.load %arg2[%c0_2, %c0_3] : memref<8x128xf32, #tpu.memory_space<vmem>>, vector<8x128xf32>
    %c8_i32 = arith.constant 8 : i32
    %5 = arith.muli %arg0, %c8_i32 : i32
    %6 = tpu.iota {dimensions = array<i32: 0>} : vector<8x1xi32>
    %7 = vector.broadcast %5 : i32 to vector<8x1xi32>
    %8 = arith.addi %7, %6 : vector<8x1xi32>
    %c20_i32 = arith.constant 20 : i32
    %9 = vector.broadcast %c20_i32 : i32 to vector<8x1xi32>
    %10 = arith.cmpi slt, %8, %9 : vector<8x1xi32>
    %cst = arith.constant 0.000000e+00 : f32
    %11 = vector.shape_cast %10 : vector<8x1xi1> to vector<8x1xi1>
    %12 = vector.broadcast %11 : vector<8x1xi1> to vector<8x128xi1>
    %13 = vector.broadcast %cst : f32 to vector<8x128xf32>
    %14 = arith.select %12, %3, %13 : vector<8x128xi1>, vector<8x128xf32>
    %cst_4 = arith.constant 0.000000e+00 : f32
    %15 = vector.shape_cast %10 : vector<8x1xi1> to vector<8x1xi1>
    %16 = vector.broadcast %15 : vector<8x1xi1> to vector<8x128xi1>
    %17 = vector.broadcast %cst_4 : f32 to vector<8x128xf32>
    %18 = arith.select %16, %4, %17 : vector<8x128xi1>, vector<8x128xf32>
    %cst_5 = arith.constant dense<0xFF800000> : vector<8xf32>
    %19 = vector.multi_reduction <maximumf>, %14, %cst_5 [1] : vector<8x128xf32> to vector<8xf32>
    %20 = vector.shape_cast %19 : vector<8xf32> to vector<8x1xf32>
    %21 = vector.broadcast %20 : vector<8x1xf32> to vector<8x128xf32>
    %22 = arith.subf %14, %21 : vector<8x128xf32>
    %23 = math.exp %22 : vector<8x128xf32>
    %cst_6 = arith.constant dense<0.000000e+00> : vector<8xf32>
    %24 = vector.multi_reduction <add>, %23, %cst_6 [1] : vector<8x128xf32> to vector<8xf32>
    %25 = vector.shape_cast %24 : vector<8xf32> to vector<8x1xf32>
    %26 = math.log %25 : vector<8x1xf32>
    %cst_7 = arith.constant dense<0.000000e+00> : vector<8xf32>
    %27 = vector.multi_reduction <add>, %18, %cst_7 [1] : vector<8x128xf32> to vector<8xf32>
    %28 = vector.shape_cast %27 : vector<8xf32> to vector<8x1xf32>
    %29 = arith.mulf %22, %18 : vector<8x128xf32>
    %30 = vector.shape_cast %29 : vector<8x128xf32> to vector<1x8x128xf32>
    %cst_8 = arith.constant dense<0.000000e+00> : vector<1xf32>
    %31 = vector.multi_reduction <add>, %30, %cst_8 [1, 2] : vector<1x8x128xf32> to vector<1xf32>
    %32 = vector.shape_cast %31 : vector<1xf32> to vector<1x1x1xf32>
    %33 = vector.extract %32[0, 0, 0] : f32 from vector<1x1x1xf32>
    %34 = arith.mulf %26, %28 : vector<8x1xf32>
    %35 = vector.shape_cast %34 : vector<8x1xf32> to vector<1x8x1xf32>
    %cst_9 = arith.constant dense<0.000000e+00> : vector<1xf32>
    %36 = vector.multi_reduction <add>, %35, %cst_9 [1, 2] : vector<1x8x1xf32> to vector<1xf32>
    %37 = vector.shape_cast %36 : vector<1xf32> to vector<1x1x1xf32>
    %38 = vector.extract %37[0, 0, 0] : f32 from vector<1x1x1xf32>
    %39 = arith.subf %33, %38 : f32
    %c0_10 = arith.constant 0 : index
    %c0_11 = arith.constant 0 : index
    %40 = vector.load %arg4[%c0_10, %c0_11] : memref<1x1xf32, #tpu.memory_space<vmem>>, vector<1x1xf32>
    %41 = vector.broadcast %39 : f32 to vector<1x1xf32>
    %42 = arith.addf %40, %41 : vector<1x1xf32>
    %c0_12 = arith.constant 0 : index
    %c0_13 = arith.constant 0 : index
    %43 = vector.load %arg4[%c0_12, %c0_13] : memref<1x1xf32, #tpu.memory_space<vmem>>, vector<1x1xf32>
    tpu.vector_store %arg4[%c0_12, %c0_13], %42 {strides = array<i32>} : memref<1x1xf32, #tpu.memory_space<vmem>>, vector<1x1xf32>,
    %c2_i32 = arith.constant 2 : i32
    %44 = arith.cmpi eq, %arg0, %c2_i32 : i32
    %45 = arith.extui %44 : i1 to i32
    %c0_i32_14 = arith.constant 0 : i32
    %46 = arith.cmpi ne, %45, %c0_i32_14 : i32
    scf.if %46 {
      %c0_15 = arith.constant 0 : index
      %c0_16 = arith.constant 0 : index
      %47 = vector.load %arg4[%c0_15, %c0_16] : memref<1x1xf32, #tpu.memory_space<vmem>>, vector<1x1xf32>
      %cst_17 = arith.constant 0.000000e+00 : f32
      %48 = vector.broadcast %cst_17 : f32 to vector<1x1xf32>
      %49 = arith.subf %48, %47 : vector<1x1xf32>
      %cst_18 = arith.constant 2.000000e+01 : f32
      %50 = vector.broadcast %cst_18 : f32 to vector<1x1xf32>
      %51 = arith.divf %49, %50 : vector<1x1xf32>
      %c0_19 = arith.constant 0 : index
      %c0_20 = arith.constant 0 : index
      %52 = vector.load %arg3[%c0_19, %c0_20] : memref<1x1xf32, #tpu.memory_space<vmem>>, vector<1x1xf32>
      tpu.vector_store %arg3[%c0_19, %c0_20], %51 {strides = array<i32>} : memref<1x1xf32, #tpu.memory_space<vmem>>, vector<1x1xf32>,
    } else {
    }
    return
  }
  func.func @transform_0(%arg0: i32) -> (i32, i32) {
    %c0_i32 = arith.constant 0 : i32
    %c0_i32_0 = arith.constant 0 : i32
    return %arg0, %c0_i32 : i32, i32
  }
  func.func @transform_1(%arg0: i32) -> (i32, i32) {
    %c0_i32 = arith.constant 0 : i32
    %c0_i32_0 = arith.constant 0 : i32
    return %arg0, %c0_i32 : i32, i32
  }
  func.func @transform_2(%arg0: i32) -> (i32, i32) {
    %c0_i32 = arith.constant 0 : i32
    %c0_i32_0 = arith.constant 0 : i32
    %c0_i32_1 = arith.constant 0 : i32
    return %c0_i32, %c0_i32_0 : i32, i32
  }
}

</mosaic_0001>

<bundles_post_ra>
// kernel: tpu_custom_call.1
= control target key start
LH: loop header
LB: loop body
LE: loop exit
PB: predicated region body
PF: predicated region fallthrough
CT: control target
= control target key end

     0   :  { %7 = vsyncpa [#allocation4], 0  ;;  %s702_s0 = inlined_call_operand.hbm [shape: f32[20,128], index: 0, kind: input, shape index: {}]   ;;  %s703_s1 = inlined_call_operand.hbm [shape: f32[20,128], index: 1, kind: input, shape index: {}]   ;;  %s704_s2 = inlined_call_operand.hbm [shape: f32[1,1], index: 2, kind: output, shape index: {}]  }
   0x1   :  { %9 = vsyncpa [#allocation4 + $0x1], 0 }
   0x2   :  { %10 = vsyncpa [#allocation7], 0 }
   0x3   :  { %12 = vsyncpa [#allocation7 + $0x1], 0 }
   0x4   :  { %13 = vsyncpa [#allocation5], 0  ;;  %s572_s9 = smov 0   ;;  %s574_s10 = smov 0  }
   0x5   :  { %s576_s11 = smov 0   ;;  %s578_s12 = smov 0  }
   0x6 LB: > { %s591_s13 = sadd.s32 4294967295, %s552_s12   ;;  %s594_s14 = sadd.s32 1, %s552_s12   ;;  %s552_s12 = sphi %s578_s12, %s712_s12   ;;  %s548_s11 = sphi %s576_s11, %s711_s11   ;;  %s544_s10 = sphi %s574_s10, %s710_s10   ;;  %s540_s9 = sphi %s572_s9, %s709_s9  }
   0x7   : > { %s23_s15 = ssub.s32 %s552_s12, %s594_s14  ;;  %s26_s16 = sadd.s32 1, %s548_s11 }
   0x8   : > { %p24_p0 = scmp.eq.s32.totalorder %s23_s15, 0  ;;  %p33_p1 = scmp.ne.s32.totalorder %s548_s11, %s544_s10 }
   0x9   : > { %p34_p2 = scmp.eq.s32.totalorder %s552_s12, 0  ;;  %p39_p3 = scmp.ne.s32.totalorder %s544_s10, %s540_s9 }
   0xa   : > { %s604_s17 = scalar_select %p24_p0, %s548_s11, %s26_s16  }
   0xb   : > { %p606_p4 = por %p34_p2, %p33_p1  ;;  %p40_p5 = scmp.eq.s32.totalorder %s591_s13, 0 }
   0xc   : > { %p378_p6 = scmp.lt.s32.totalorder %s552_s12, 3  ;;  %s617_s20 = sand.u32 1, %s548_s11  }
   0xd   : > { %p612_p7 = por %p40_p5, %p39_p3  ;;  %s345_s21 = sshll.u32 %s617_s20, 3 }
   0xe   : > { %s346_s22 = sshll.u32 %s552_s12, 3  ;;  %s114_s26 = scalar_lea.vmem [#allocation3], %s345_s21 }
   0xf   : > { %s118_s25 = scalar_lea.hbm %s702_s0, %s346_s22  ;;  %s122_s27 = sshll.u32 %s114_s26, 4  ;;  %s123_s27 = int_to_ptr.vmem [resolvable:$true] %s122_s27 }
  0x10   : > { %s120_s28 = sshll.u32 %s118_s25, 4  ;;  %p626_p8 = pnand %p378_p6, %p606_p4  ;;  %s121_s28 = int_to_ptr.hbm [resolvable:$true] %s120_s28 }
  0x11   : > { %p349_p9 = scmp.ge.s32.totalorder %s552_s12, 1  ;;  %p146_p10 = scmp.lt.s32.totalorder %s552_s12, 4 }
  0x12   : > { %s111_s30 = scalar_lea.sflag [#allocation4], %s617_s20  ;;  %s422_s3 = sshra.s32 %s121_s28, 4  ;;  %s423_s3 = int_to_ptr.hbm [resolvable:$true] %s422_s3 }
  0x13   : > { %s424_s4 = scalar_lea.hbm %s423_s3, 8  ;;  %p426_p12 = pneg %p626_p8 }
  0x14   : > { %p425_p11 = scmp.ne.s32.totalorder %s423_s3, %s424_s4  ;;  %s429_s7 = scalar_lea.hbm %s702_s0, 24 }
  0x15   : > { %p430_p1 = scmp.lt.s32.totalorder %s423_s3, %s702_s0  ;;  %p431_p2 = scmp.lt.s32.totalorder %s429_s7, %s424_s4 }
  0x16   : > { %p427_p13 = pnand %p426_p12, %p425_p11 }
  0x17   : > { %p432_p3 = por %p431_p2, %p430_p1 }
  0x18   : > { %p428_p0 = pneg %p427_p13 }
  0x1a   : > { %p433_p4 = pnand %p432_p3, %p428_p0 }
  0x1c   : > { %436 = shalt.err (!%p433_p4)
}
  0x1d   : > { %374 = dma.hbm_to_vmem [thread:$0]  (!%p626_p8), %s121_s28, 128, %s123_s27, %s111_s30  }
  0x1e   : > { %p650_p5 = pnand %p349_p9, %p146_p10  ;;  %s137_s23 = scalar_lea.hbm %s703_s1, %s346_s22 }
  0x1f   : > { %s133_s24 = scalar_lea.vmem [#allocation6], %s345_s21  ;;  %s139_s26 = sshll.u32 %s137_s23, 4  ;;  %s140_s26 = int_to_ptr.hbm [resolvable:$true] %s139_s26 }
  0x20   : > { %s141_s25 = sshll.u32 %s133_s24, 4  ;;  %s130_s3 = scalar_lea.sflag [#allocation7], %s617_s20  ;;  %s142_s25 = int_to_ptr.vmem [resolvable:$true] %s141_s25 }
  0x21   : > { %s452_s4 = sshra.s32 %s140_s26, 4  ;;  %s459_s28 = scalar_lea.hbm %s703_s1, 24  ;;  %s453_s4 = int_to_ptr.hbm [resolvable:$true] %s452_s4 }
  0x22   : > { %s454_s5 = scalar_lea.hbm %s453_s4, 8  ;;  %p460_p11 = scmp.lt.s32.totalorder %s453_s4, %s703_s1 }
  0x23   : > { %p455_p6 = scmp.ne.s32.totalorder %s453_s4, %s454_s5  ;;  %p461_p13 = scmp.lt.s32.totalorder %s459_s28, %s454_s5 }
  0x25   : > { %p457_p9 = pnand %p455_p6, %p426_p12  ;;  %p462_p0 = por %p461_p13, %p460_p11 }
  0x27   : > { %p458_p10 = pneg %p457_p9 }
  0x29   : > { %p463_p1 = pnand %p462_p0, %p458_p10 }
  0x2b   : > { %466 = shalt.err (!%p463_p1)
}
  0x2c   : > { %377 = dma.hbm_to_vmem [thread:$0]  (!%p626_p8), %s140_s26, 128, %s142_s25, %s130_s3  }
  0x2d   : > { %150 = sbr.rel (%p650_p5) target bundleno = 534 (0x216), region = 28  ;;  %s152_s20 = sand.u32 (!%p650_p5), 1, %s544_s10  }
  0x2e   : > { %s350_s21 = sshll.u32 (!%p650_p5), %s152_s20, 3  ;;  %s153_s6 = scalar_lea.sflag (!%p650_p5), [#allocation4], %s152_s20 }
  0x2f   : > { %s156_s7 = scalar_lea.vmem (!%p650_p5), [#allocation3], %s350_s21 }
  0x32   : > { %527 = dma.done.wait (%p612_p7), %s153_s6, 128  }
  0x33   : > { %529 = vsyncadd (%p612_p7), %s153_s6, 4294967168  ;;  %s163_s8 = scalar_lea.sflag [#allocation7], %s152_s20  ;;  %s166_s9 = scalar_lea.vmem [#allocation6], %s350_s21 }
  0x34   : > { %531 = dma.done.wait (%p612_p7), %s163_s8, 128  }
  0x35   : > { %533 = vsyncadd (%p612_p7), %s163_s8, 4294967168  ;;  %p352_p8 = scmp.ne.s32.totalorder %s591_s13, 0 }
  0x37   : > { %191 = sbr.rel (%p352_p8) target bundleno = 62 (0x3e), region = 40 }
  0x3c   : > { %vm192_vm0 = vcmask 0   ;;  %v554_v0 = vmov 0.0  }
  0x3d   : > { %193 = vst.msk [vmem:[#allocation2] sm:$0x1] %vm192_vm0, %v554_v0 }
  0x3e PF: > { %s353_s29 = sshll.u32 %s591_s13, 3  ;;  %v197_v1 = vlaneseq  ;;  %v194_v4 = vld [vmem:[%s156_s7] sm:$0xff]  ;;  %v195_v6 = vld [vmem:[%s166_s9] sm:$0xff]  ;;  %vm228_vm2 = vcmask 7168   ;;  %vm243_vm3 = vcmask 0   ;;  %p354_p7 = scmp.ne.s32.totalorder %s591_s13, 2 }
  0x3f   : > { %v199_v2 = vstv %s353_s29 }
  0x40   : > { %v198_v3 = vshrl.u32 %v197_v1, 7 }
  0x42   : > { %v200_v5 = vadd.s32 %v199_v2, %v198_v3 }
  0x44   : > { %vm201_vm1 = vcmp.lt.s32.totalorder %v200_v5, 20  ;;  %v240_v34 = vld [vmem:[#allocation2] sm:$0x1] }
  0x45   : > { %v204_v7 = vsel %vm201_vm1, %v194_v4, 0.0  ;;  %v205_v8 = vsel %vm201_vm1, %v195_v6, 0.0 }
  0x46   : > { %206 = vmax.xlane.f32.xlu0 %v204_v7  ;;  %215 = vadd.xlane.f32.xlu1 %v205_v8 }
  0xb9   : > { %v207_v9 = vpop.xlane.xlu0 %206  ;;  %v216_v14 = vpop.xlane.xlu1 %215 }
  0xba   : > { %v208_v10 = vsub.f32 %v204_v7, %v207_v9 }
  0xbc   : > { %v209_v11 = vmul.f32 1.442695, %v208_v10  ;;  %v217_v12 = vmul.f32 %v208_v10, %v205_v8 }
  0xbe   : > { %416 = vpow2.f32 %v209_v11  ;;  %218 = vadd.xlane.f32.xlu1 %v217_v12 }
  0xc4   : > { %v417_v13 = vpop.eup %416 }
  0xc5   : > { %211 = vadd.xlane.f32.xlu0 %v417_v13 }
 0x131   : > { %v219_v15 = vpop.xlane.xlu1 %218 }
 0x132   : > { %v220_v16 = vrot.slane %v219_v15, 4 }
 0x134   : > { %v221_v17 = vadd.f32 %v220_v16, %v219_v15 }
 0x136   : > { %v222_v18 = vrot.slane %v221_v17, 2 }
 0x138   : > { %v212_v19 = vpop.xlane.xlu0 %211  ;;  %v223_v20 = vadd.f32 %v222_v18, %v221_v17 }
 0x139   : > { %418 = vlog2.f32 %v212_v19 }
 0x13a   : > { %v224_v21 = vrot.slane %v223_v20, 1 }
 0x13c   : > { %v225_v22 = vadd.f32 %v224_v21, %v223_v20 }
 0x13e   : > { %359 = vpush %v225_v22 }
 0x13f   : > { %v419_v23 = vpop.eup %418 }
 0x140   : > { %v214_v24 = vmul.f32 0.6931472, %v419_v23 }
 0x142   : > { %v227_v25 = vmul.f32 %v216_v14, %v214_v24 }
 0x144   : > { %v229_v26 = vsel %vm228_vm2, %v227_v25, 0.0 }
 0x145   : > { %230 = vadd.xlane.f32.xlu2 %v229_v26 }
 0x16f   : > { %s360_s19 = spop %359 }
 0x1b8   : > { %v231_v27 = vpop.xlane.xlu2 %230 }
 0x1b9   : > { %v232_v28 = vrot.slane %v231_v27, 4 }
 0x1bb   : > { %v233_v29 = vadd.f32 %v232_v28, %v231_v27 }
 0x1bd   : > { %v234_v30 = vrot.slane %v233_v29, 2 }
 0x1bf   : > { %v235_v31 = vadd.f32 %v234_v30, %v233_v29 }
 0x1c1   : > { %v236_v32 = vrot.slane %v235_v31, 1 }
 0x1c3   : > { %v237_v33 = vadd.f32 %v236_v32, %v235_v31 }
 0x1c5   : > { %361 = vpush %v237_v33 }
 0x1f6   : > { %s362_s15 = spop %361 }
 0x1f7   : > { %s239_s16 = ssub.f32 %s360_s19, %s362_s15 }
 0x1f8   : > { %248 = sbr.rel (%p354_p7) target bundleno = 529 (0x211), region = 44 }
 0x1f9   : > { %v241_v35 = vstv %s239_s16 }
 0x1fa   : > { %v242_v36 = vadd.f32 %v241_v35, %v240_v34 }
 0x1fc   : > { %244 = vst.msk [vmem:[#allocation2] sm:$0x1] %vm243_vm3, %v242_v36 }
 0x1fd   : > { %v555_v37 = vmov 20.0  }
 0x1fe   : > { %420 = vrcp.f32 %v555_v37 }
 0x203   : > { %v249_v40 = vld [vmem:[#allocation2] sm:$0x1] }
 0x204   : > { %v421_v38 = vpop.eup %420  ;;  %v250_v43 = vsub.f32 0.0, %v249_v40 }
 0x205   : > { %v252_v39 = vmul.f32 20.0, %v421_v38  ;;  %vm256_vm4 = vweird.f32 %v421_v38 }
 0x207   : > { %v253_v41 = vsub.f32 1.0, %v252_v39 }
 0x209   : > { %v254_v42 = vmul.f32 %v421_v38, %v253_v41 }
 0x20b   : > { %v255_v44 = vadd.f32 %v421_v38, %v254_v42 }
 0x20d   : > { %v257_v45 = vsel %vm256_vm4, %v421_v38, %v255_v44 }
 0x20e   : > { %v258_v46 = vmul.f32 %v257_v45, %v250_v43 }
 0x210   : > { %259 = vst.msk [vmem:[#allocation8] sm:$0x1] %vm243_vm3, %v258_v46 }
 0x211 PF: > { %p379_p12 = scmp.eq.s32.totalorder %s591_s13, 2  ;;  %s556_s18 = smov [#allocation8]  }
 0x212   : > { %s266_s23 = sshll.u32 %s556_s18, 4  ;;  %s268_s26 = sshll.u32 %s704_s2, 4  ;;  %s267_s23 = int_to_ptr.vmem [resolvable:$true] %s266_s23  ;;  %s269_s26 = int_to_ptr.hbm [resolvable:$true] %s268_s26 }
 0x213   : > { %368 = dma.vmem_to_hbm [thread:$0]  (%p379_p12), %s267_s23, 16, %s269_s26, [#allocation5]  }
 0x214   : > { %535 = dma.done.wait (%p379_p12), [#allocation5], 16  }
 0x215   : > { %537 = vsyncadd (%p379_p12), [#allocation5], 4294967280 }
 0x216 PF: > { %p16_p2 = scmp.ge.s32.totalorder %s594_s14, 5   ;;  %s709_s9 = smov %s544_s10 }
 0x217   : > { %s710_s10 = smov %s548_s11  ;;  %s711_s11 = smov %s604_s17 }
 0x218   : > { %s712_s12 = smov %s594_s14  ;;  %18 = sbr.rel (!%p16_p2) target bundleno = 6 (0x6), region = 86 }
 0x21d   :  { %282 = vsyncpa [#allocation4], 1 }
 0x21e   :  { %284 = vsyncpa [#allocation4 + $0x1], 1 }
 0x21f   :  { %285 = vsyncpa [#allocation7], 1 }
 0x220   :  { %287 = vsyncpa [#allocation7 + $0x1], 1 }
 0x221   :  { %288 = vsyncpa [#allocation5], 1 }
 0x222   :  { %290 = vsyncpa [#allocation5 + $0x1], 1 }

</bundles_post_ra>
